<compile_context>
chip_gen: v7x
topology: tpu7x:2x2x1
jax: 0.10.0
libtpu: 0.0.40
codegen_flags: <defaults>
</compile_context>

<pallas_src>
import jax
import jax.numpy as jnp
from jax.experimental import pallas as pl
from jax.experimental.pallas import tpu as pltpu

INPUT_SIZE = 3
HIDDEN_SIZE = 16
NUM_CLASSES = 1

# Tiling policy. Double-buffered VMEM cost is ~128 bytes per batch lane:
# x block pads 3->8 sublanes (32*TB bytes/buffer), out block pads 1->8 (32*TB),
# both double-buffered -> ~128*TB bytes total.
_TB_MAX = 131072          # ~16 MiB of block buffers; safe on v5e/v6e/v7x
_TB_MIN_LARGE = 32768     # don't drop below 32K lanes once the batch allows it
_TARGET_STEPS = 8         # enough grid steps for v7x megacore load balance
_MIN_PALLAS_BATCH = 4096  # below this, plain XLA beats the pallas_call fixed cost


def _round_up(n, m):
    return ((n + m - 1) // m) * m


def mlp_kernel(x_ref, w1_ref, b1_ref, w2_ref, b2_ref, o_ref):
    """One batch tile; batch sits on the lane axis.

    x_ref : (INPUT_SIZE, TB)          activations (f32 or bf16), lane-dense
    w1_ref: (HIDDEN_SIZE, INPUT_SIZE) PyTorch (out_features, in_features) layout
    b1_ref: (HIDDEN_SIZE, 1)
    w2_ref: (HIDDEN_SIZE, 1)          == l5.weight.T
    b2_ref: (1, 1)
    o_ref : (NUM_CLASSES, TB)         lane-dense f32 output
    """
    # Upcast once: mandatory on v5e (no bf16 VPU math); free on v6e/v7x and
    # hidden under the DMA on this bandwidth-bound kernel.
    x = x_ref[...].astype(jnp.float32)   # (3, TB)
    w1 = w1_ref[...]                     # (16, 3)

    # Layer 1 on the VPU: K=3 unrolled broadcast FMAs (skip the MXU entirely).
    h = w1[:, 0:1] * x[0:1, :]           # (16,1)*(1,TB) -> (16,TB)
    for k in range(1, INPUT_SIZE):
        h = h + w1[:, k:k + 1] * x[k:k + 1, :]
    h = h + b1_ref[...]                  # bias broadcast over lanes (batch)
    h = jnp.maximum(h, 0.0)              # ReLU

    # Layer 2: N=1 -> weighted sum over the 16 hidden channels (sublane reduce).
    out = jnp.sum(h * w2_ref[...], axis=0, keepdims=True) + b2_ref[...]
    o_ref[...] = out.astype(o_ref.dtype)


def _pick_tile(batch_padded):
    """Batch tile: scale with B, >=32K lanes when possible, capped for VMEM."""
    tb = _round_up(pl.cdiv(batch_padded, _TARGET_STEPS), 128)
    tb = max(tb, _TB_MIN_LARGE)
    tb = min(tb, _TB_MAX, batch_padded)
    return tb


def neural_net_forward_t(x_t, w1, b1, w2, b2):
    """Forward pass with activations already in (features, batch) layout.

    Preferred entry point for large batches: no extra transpose pass over x in HBM.
    x_t: (3, B), f32 or bf16. Returns (B, 1) float32.
    """
    _, B = x_t.shape
    Bp = _round_up(B, 128)               # pad to full lanes only, NOT to a TB multiple
    if Bp != B:
        x_t = jnp.pad(x_t, ((0, 0), (0, Bp - B)))
    TB = _pick_tile(Bp)
    num_steps = pl.cdiv(Bp, TB)          # partial last block handled by Pallas

    w1_f32 = w1.astype(jnp.float32)
    b1_col = b1.reshape(HIDDEN_SIZE, 1).astype(jnp.float32)
    w2_col = w2.reshape(HIDDEN_SIZE, 1).astype(jnp.float32)   # valid: NUM_CLASSES == 1
    b2_2d = b2.reshape(1, 1).astype(jnp.float32)

    # Double-buffered x + out blocks (both 8-sublane padded): ~128 bytes / lane.
    footprint = 128 * TB
    vmem_limit = int(min(footprint + (16 << 20), 48 << 20))   # < v7x 64 MiB physical

    out_t = pl.pallas_call(
        mlp_kernel,
        out_shape=jax.ShapeDtypeStruct((NUM_CLASSES, Bp), jnp.float32),
        grid=(num_steps,),
        in_specs=[
            pl.BlockSpec((INPUT_SIZE, TB), lambda i: (0, i)),           # x: pipelined tile
            pl.BlockSpec((HIDDEN_SIZE, INPUT_SIZE), lambda i: (0, 0)),  # w1: VMEM-resident
            pl.BlockSpec((HIDDEN_SIZE, 1), lambda i: (0, 0)),           # b1: VMEM-resident
            pl.BlockSpec((HIDDEN_SIZE, 1), lambda i: (0, 0)),           # w2: VMEM-resident
            pl.BlockSpec((1, 1), lambda i: (0, 0)),                     # b2: VMEM-resident
        ],
        out_specs=pl.BlockSpec((NUM_CLASSES, TB), lambda i: (0, i)),
        compiler_params=pltpu.CompilerParams(
            dimension_semantics=("parallel",),     # megacore-shard the batch on v7x
            vmem_limit_bytes=vmem_limit,
            # Let XLA fuse the caller-side cast/transpose/pad of x directly into this
            # call's input instead of materializing a second copy of x in HBM.
            allow_input_fusion=[True, False, False, False, False],
        ),
    )(x_t, w1_f32, b1_col, w2_col, b2_2d)

    return out_t[:, :B].T                                     # (B, 1)


def _forward_ref(x, w1, b1, w2, b2):
    """Pure-XLA reference / small-batch fast path: relu(x @ W1^T + b1) @ W2^T + b2."""
    return jnp.maximum(x @ w1.T + b1, 0.0) @ w2.T + b2


def neural_net_forward(x, w1, b1, w2, b2, *, activation_dtype=jnp.float32,
                       force_pallas=False):
    """Forward pass of NeuralNet with PyTorch-layout inputs.

    x: (B, 3); w1: (16, 3); b1: (16,); w2: (1, 16); b2: (1,). Returns (B, 1) f32.
    """
    B = x.shape[0]
    if B < _MIN_PALLAS_BATCH and not force_pallas:
        # Tiny job: pallas_call fixed setup cost dominates; let XLA fuse it instead.
        return _forward_ref(x, w1, b1, w2, b2).astype(jnp.float32)
    # Batch-on-lanes layout (+ optional bf16 activations to halve x HBM reads).
    x_t = x.astype(activation_dtype).T
    return neural_net_forward_t(x_t, w1, b1, w2, b2)


def init_params(key):
    """Deterministic init mimicking nn.Linear's uniform(-1/sqrt(fan_in), 1/sqrt(fan_in)).

    Weights kept in PyTorch's native (out_features, in_features) layout."""
    k1, k2, k3, k4 = jax.random.split(key, 4)
    bound1 = 1.0 / jnp.sqrt(INPUT_SIZE)
    bound2 = 1.0 / jnp.sqrt(HIDDEN_SIZE)
    w1 = jax.random.uniform(k1, (HIDDEN_SIZE, INPUT_SIZE), jnp.float32, -bound1, bound1)
    b1 = jax.random.uniform(k2, (HIDDEN_SIZE,), jnp.float32, -bound1, bound1)
    w2 = jax.random.uniform(k3, (NUM_CLASSES, HIDDEN_SIZE), jnp.float32, -bound2, bound2)
    b2 = jax.random.uniform(k4, (NUM_CLASSES,), jnp.float32, -bound2, bound2)
    return w1, b1, w2, b2


if __name__ == "__main__":
    key = jax.random.PRNGKey(0)
    k_params, k_x = jax.random.split(key)
    w1, b1, w2, b2 = init_params(k_params)

    # Small demo batch; 200 also exercises the pad-to-128-lanes + slice-back path.
    batch = 200
    x = jax.random.normal(k_x, (batch, INPUT_SIZE), dtype=jnp.float32)
    ref = _forward_ref(x, w1, b1, w2, b2)

    # 1) Pallas kernel, f32 activations (matches the f32 reference tightly).
    out = jax.block_until_ready(
        neural_net_forward(x, w1, b1, w2, b2, force_pallas=True))
    assert out.shape == (batch, NUM_CLASSES)
    assert jnp.allclose(out, ref, atol=1e-5, rtol=1e-5), float(jnp.max(jnp.abs(out - ref)))

    # 2) Pallas kernel, bf16 activations (halves x HBM traffic; looser tolerance).
    out_bf16 = jax.block_until_ready(
        neural_net_forward(x, w1, b1, w2, b2, force_pallas=True,
                           activation_dtype=jnp.bfloat16))
    assert jnp.allclose(out_bf16, ref, atol=5e-2, rtol=5e-2), \
        float(jnp.max(jnp.abs(out_bf16 - ref)))

    # 3) Small-batch fast path (bypasses pallas_call entirely).
    out_fast = jax.block_until_ready(neural_net_forward(x, w1, b1, w2, b2))
    assert jnp.allclose(out_fast, ref, atol=1e-6, rtol=1e-6)

    print("KERNEL_OK")
</pallas_src>

<mosaic_0001>
module attributes {stable_mosaic.version = 11 : i64} {
  func.func @mlp_kernel(%arg0: i32, %arg1: memref<3x256xf32, #tpu.memory_space<vmem>>, %arg2: memref<16x3xf32, #tpu.memory_space<vmem>>, %arg3: memref<16x1xf32, #tpu.memory_space<vmem>>, %arg4: memref<16x1xf32, #tpu.memory_space<vmem>>, %arg5: memref<1x1xf32, #tpu.memory_space<vmem>>, %arg6: memref<1x256xf32, #tpu.memory_space<vmem>>) attributes {dimension_semantics = [#tpu.dimension_semantics<parallel>], iteration_bounds = array<i64: 1>, scalar_prefetch = 0 : i64, scratch_operands = 0 : i64, tpu.core_type = #tpu.core_type<tc>, window_params = [{transform_indices = @transform_0, window_bounds = array<i64: 3, 256>}, {pipeline_mode = #tpu.pipeline_mode<synchronous>, transform_indices = @transform_1, window_bounds = array<i64: 16, 3>}, {pipeline_mode = #tpu.pipeline_mode<synchronous>, transform_indices = @transform_2, window_bounds = array<i64: 16, 1>}, {pipeline_mode = #tpu.pipeline_mode<synchronous>, transform_indices = @transform_3, window_bounds = array<i64: 16, 1>}, {pipeline_mode = #tpu.pipeline_mode<synchronous>, transform_indices = @transform_4, window_bounds = array<i64: 1, 1>}, {transform_indices = @transform_5, window_bounds = array<i64: 1, 256>}]} {
    %c0 = arith.constant 0 : index
    %c0_0 = arith.constant 0 : index
    %0 = vector.load %arg1[%c0, %c0_0] : memref<3x256xf32, #tpu.memory_space<vmem>>, vector<3x256xf32>
    %c0_1 = arith.constant 0 : index
    %c0_2 = arith.constant 0 : index
    %1 = vector.load %arg2[%c0_1, %c0_2] : memref<16x3xf32, #tpu.memory_space<vmem>>, vector<16x3xf32>
    %2 = vector.extract_strided_slice %1 {offsets = [0, 0], sizes = [16, 1], strides = [1, 1]} : vector<16x3xf32> to vector<16x1xf32>
    %3 = vector.extract_strided_slice %0 {offsets = [0, 0], sizes = [1, 256], strides = [1, 1]} : vector<3x256xf32> to vector<1x256xf32>
    %4 = vector.broadcast %2 : vector<16x1xf32> to vector<16x256xf32>
    %5 = vector.broadcast %3 : vector<1x256xf32> to vector<16x256xf32>
    %6 = arith.mulf %4, %5 : vector<16x256xf32>
    %7 = vector.extract_strided_slice %1 {offsets = [0, 1], sizes = [16, 1], strides = [1, 1]} : vector<16x3xf32> to vector<16x1xf32>
    %8 = vector.extract_strided_slice %0 {offsets = [1, 0], sizes = [1, 256], strides = [1, 1]} : vector<3x256xf32> to vector<1x256xf32>
    %9 = vector.broadcast %7 : vector<16x1xf32> to vector<16x256xf32>
    %10 = vector.broadcast %8 : vector<1x256xf32> to vector<16x256xf32>
    %11 = arith.mulf %9, %10 : vector<16x256xf32>
    %12 = arith.addf %6, %11 : vector<16x256xf32>
    %13 = vector.extract_strided_slice %1 {offsets = [0, 2], sizes = [16, 1], strides = [1, 1]} : vector<16x3xf32> to vector<16x1xf32>
    %14 = vector.extract_strided_slice %0 {offsets = [2, 0], sizes = [1, 256], strides = [1, 1]} : vector<3x256xf32> to vector<1x256xf32>
    %15 = vector.broadcast %13 : vector<16x1xf32> to vector<16x256xf32>
    %16 = vector.broadcast %14 : vector<1x256xf32> to vector<16x256xf32>
    %17 = arith.mulf %15, %16 : vector<16x256xf32>
    %18 = arith.addf %12, %17 : vector<16x256xf32>
    %c0_3 = arith.constant 0 : index
    %c0_4 = arith.constant 0 : index
    %19 = vector.load %arg3[%c0_3, %c0_4] : memref<16x1xf32, #tpu.memory_space<vmem>>, vector<16x1xf32>
    %20 = vector.broadcast %19 : vector<16x1xf32> to vector<16x256xf32>
    %21 = arith.addf %18, %20 : vector<16x256xf32>
    %cst = arith.constant 0.000000e+00 : f32
    %22 = vector.broadcast %cst : f32 to vector<16x256xf32>
    %23 = arith.maximumf %21, %22 : vector<16x256xf32>
    %c0_5 = arith.constant 0 : index
    %c0_6 = arith.constant 0 : index
    %24 = vector.load %arg4[%c0_5, %c0_6] : memref<16x1xf32, #tpu.memory_space<vmem>>, vector<16x1xf32>
    %25 = vector.broadcast %24 : vector<16x1xf32> to vector<16x256xf32>
    %26 = arith.mulf %23, %25 : vector<16x256xf32>
    %cst_7 = arith.constant dense<0.000000e+00> : vector<256xf32>
    %27 = vector.multi_reduction <add>, %26, %cst_7 [0] : vector<16x256xf32> to vector<256xf32>
    %28 = vector.shape_cast %27 : vector<256xf32> to vector<1x256xf32>
    %c0_8 = arith.constant 0 : index
    %c0_9 = arith.constant 0 : index
    %29 = vector.load %arg5[%c0_8, %c0_9] : memref<1x1xf32, #tpu.memory_space<vmem>>, vector<1x1xf32>
    %30 = vector.broadcast %29 : vector<1x1xf32> to vector<1x256xf32>
    %31 = arith.addf %28, %30 : vector<1x256xf32>
    %c0_10 = arith.constant 0 : index
    %c0_11 = arith.constant 0 : index
    %32 = vector.load %arg6[%c0_10, %c0_11] : memref<1x256xf32, #tpu.memory_space<vmem>>, vector<1x256xf32>
    tpu.vector_store %arg6[%c0_10, %c0_11], %31 {strides = array<i32>} : memref<1x256xf32, #tpu.memory_space<vmem>>, vector<1x256xf32>,
    return
  }
  func.func @transform_0(%arg0: i32) -> (i32, i32) {
    %c0_i32 = arith.constant 0 : i32
    %c0_i32_0 = arith.constant 0 : i32
    return %c0_i32, %arg0 : i32, i32
  }
  func.func @transform_1(%arg0: i32) -> (i32, i32) {
    %c0_i32 = arith.constant 0 : i32
    %c0_i32_0 = arith.constant 0 : i32
    %c0_i32_1 = arith.constant 0 : i32
    return %c0_i32, %c0_i32_0 : i32, i32
  }
  func.func @transform_2(%arg0: i32) -> (i32, i32) {
    %c0_i32 = arith.constant 0 : i32
    %c0_i32_0 = arith.constant 0 : i32
    %c0_i32_1 = arith.constant 0 : i32
    return %c0_i32, %c0_i32_0 : i32, i32
  }
  func.func @transform_3(%arg0: i32) -> (i32, i32) {
    %c0_i32 = arith.constant 0 : i32
    %c0_i32_0 = arith.constant 0 : i32
    %c0_i32_1 = arith.constant 0 : i32
    return %c0_i32, %c0_i32_0 : i32, i32
  }
  func.func @transform_4(%arg0: i32) -> (i32, i32) {
    %c0_i32 = arith.constant 0 : i32
    %c0_i32_0 = arith.constant 0 : i32
    %c0_i32_1 = arith.constant 0 : i32
    return %c0_i32, %c0_i32_0 : i32, i32
  }
  func.func @transform_5(%arg0: i32) -> (i32, i32) {
    %c0_i32 = arith.constant 0 : i32
    %c0_i32_0 = arith.constant 0 : i32
    return %c0_i32, %arg0 : i32, i32
  }
}

</mosaic_0001>

<bundles_post_ra>
// kernel: tpu_custom_call.1
= control target key start
LH: loop header
LB: loop body
LE: loop exit
PB: predicated region body
PF: predicated region fallthrough
CT: control target
= control target key end

     0   :  { %s349_s0 = inlined_call_operand.vmem [shape: f32[3,256], index: 0, kind: input, shape index: {}]   ;;  %s350_s1 = inlined_call_operand.vmem [shape: f32[16,3], index: 1, kind: input, shape index: {}]   ;;  %s351_s2 = inlined_call_operand.vmem [shape: f32[16,1], index: 2, kind: input, shape index: {}]   ;;  %s352_s3 = inlined_call_operand.vmem [shape: f32[16,1], index: 3, kind: input, shape index: {}]   ;;  %s353_s4 = inlined_call_operand.<no memory space> [shape: f32[1,1], index: 4, kind: input, shape index: {}]   ;;  %s354_s5 = inlined_call_operand.hbm [shape: f32[1,256], index: 5, kind: output, shape index: {}]  }
   0x1   :  { %v10_v0 = vstv %s353_s4 }
   0x2   :  { %11 = vst [vmem:[#allocation2] sm:$0x1] %v10_v0 }
   0x3   :  { %v24_v1 = vld [vmem:[%s350_s1] sm:$0xff]  ;;  %v261_v2 = vmov 1   ;;  %v262_v3 = vmov 0  }
   0x4   :  { %232 = vset.pattern.permute.xlu1 %v261_v2  ;;  %231 = vset.pattern.permute.xlu0 %v262_v3 }
   0x5   :  { %60 = vperm.xlu1 %232, %v24_v1   ;;  %28 = vperm.xlu0 %231, %v24_v1  }
   0x6   :  { %12 = vsyncpa [#allocation4], 0  ;;  %v25_v4 = vld [vmem:[%s350_s1 + $0x8] sm:$0xff]  ;;  %v263_v5 = vmov 2   ;;  %v127_v6 = vld [vmem:[%s351_s2] sm:$0xff]  ;;  %v37_v11 = vlaneseq }
   0x7   :  { %v128_v7 = vld [vmem:[%s351_s2 + $0x8] sm:$0xff]  ;;  %v147_v8 = vld [vmem:[%s352_s3] sm:$0xff] }
   0x8   :  { %v148_v10 = vld [vmem:[%s352_s3 + $0x8] sm:$0xff]  ;;  %v318_v12 = vshrl.u32 %v37_v11, 7  ;;  %v23_v17 = vld [vmem:[%s349_s0] sm:$0x77]  ;;  %s265_s0 = smov [#allocation3]   ;;  %vm209_vm0 = vcmp.lt.s32.totalorder %v37_v11, 256 }
   0x9   :  { %64 = vperm.xlu1 %232, %v25_v4   ;;  %33 = vperm.xlu0 %231, %v25_v4   ;;  %v177_v9 = vld [vmem:[#allocation2] sm:$0x1]  ;;  %s218_s3 = sshll.u32 %s265_s0, 4  ;;  %s219_s3 = int_to_ptr.vmem [resolvable:$true] %s218_s3 }
   0xa   :  { %v69_v13 = vsub.s32 1, %v318_v12  ;;  %v73_v14 = vsub.s32 5, %v318_v12  ;;  %v323_v15 = vsub.s32 0, %v318_v12  ;;  %v43_v16 = vsub.s32 4, %v318_v12  ;;  %s237_s6 = scalar_lea.vmem %s219_s3, 32  ;;  %p242_p1 = scmp.lt.s32.totalorder %s219_s3, %s219_s3 }
   0xb   :  { %v103_v22 = vsub.s32 2, %v318_v12  ;;  %v107_v23 = vsub.s32 6, %v318_v12  ;;  %p238_p0 = scmp.ne.s32.totalorder %s219_s3, %s237_s6  ;;  %p243_p2 = scmp.lt.s32.totalorder %s237_s6, %s237_s6 }
   0xc   :  { %v70_v18 = vrot.slane %v23_v17, %v69_v13  ;;  %v74_v19 = vrot.slane %v23_v17, %v73_v14  ;;  %v40_v20 = vrot.slane %v23_v17, %v323_v15  ;;  %v44_v21 = vrot.slane %v23_v17, %v43_v16 }
   0xd   :  { %234 = vset.pattern.permute.xlu1 %v263_v5  ;;  %233 = vset.pattern.permute.xlu0 %v263_v5  ;;  %v104_v30 = vrot.slane %v23_v17, %v103_v22  ;;  %v108_v31 = vrot.slane %v23_v17, %v107_v23  ;;  %p244_p3 = por %p243_p2, %p242_p1 }
   0xe   :  { %98 = vperm.xlu1 %234, %v25_v4   ;;  %94 = vperm.xlu0 %233, %v24_v1   ;;  %v80_v26 = vrot.slane %v70_v18, %v69_v13  ;;  %v84_v27 = vrot.slane %v74_v19, %v69_v13  ;;  %v50_v28 = vrot.slane %v40_v20, %v323_v15 }
   0xf   :  { %v54_v29 = vrot.slane %v44_v21, %v323_v15  ;;  %v114_v38 = vrot.slane %v104_v30, %v103_v22  ;;  %v118_v39 = vrot.slane %v108_v31, %v103_v22  ;;  %v264_v21 = vmov 1966171168   ;;  %p245_p4 = pnand %p244_p3, %p238_p0 }
  0x10   :  { %v193_v22 = vunpack.c.l.s4 %v264_v21 }
  0x12   :  { %235 = vset.pattern.permute.xlu1 %v262_v3  ;;  %236 = vset.pattern.permute.xlu0 %v262_v3 }
  0x13   :  { %131 = vperm.xlu1 %235, %v127_v6   ;;  %136 = vperm.xlu0 %236, %v128_v7  }
  0x17   :  { %151 = vperm.xlu1 %235, %v147_v8   ;;  %180 = vperm.xlu0 %236, %v177_v9  }
  0x1b   :  { %156 = vperm.xlu1 %235, %v148_v10  }
  0x84   :  { %v61_v24 = vpop.permute.xlu1 %60  ;;  %v29_v25 = vpop.permute.xlu0 %28 }
  0x85   :  { %v85_v34 = vmul.f32 %v80_v26, %v61_v24  ;;  %v86_v35 = vmul.f32 %v84_v27, %v61_v24  ;;  %v55_v36 = vmul.f32 %v50_v28, %v29_v25  ;;  %v56_v37 = vmul.f32 %v54_v29, %v29_v25 }
  0x87   :  { %v89_v44 = vadd.f32 %v85_v34, %v55_v36  ;;  %v90_v45 = vadd.f32 %v86_v35, %v56_v37 }
  0x88   :  { %v65_v32 = vpop.permute.xlu1 %64  ;;  %v34_v33 = vpop.permute.xlu0 %33 }
  0x89   :  { %v87_v40 = vmul.f32 %v80_v26, %v65_v32  ;;  %v88_v41 = vmul.f32 %v84_v27, %v65_v32  ;;  %v57_v42 = vmul.f32 %v50_v28, %v34_v33  ;;  %v58_v43 = vmul.f32 %v54_v29, %v34_v33 }
  0x8a   :  { %v194_v28 = vunpack.c.0.s8 %v193_v22 }
  0x8b   :  { %v91_v52 = vadd.f32 %v87_v40, %v57_v42  ;;  %v92_v53 = vadd.f32 %v88_v41, %v58_v43 }
  0x8c   :  { %v197_v34 = vsub.s32 %v194_v28, %v318_v12 }
  0x8d   :  { %v99_v46 = vpop.permute.xlu1 %98  ;;  %v95_v47 = vpop.permute.xlu0 %94 }
  0x8e   :  { %v121_v48 = vmul.f32 %v114_v38, %v99_v46  ;;  %v122_v49 = vmul.f32 %v118_v39, %v99_v46  ;;  %v119_v50 = vmul.f32 %v114_v38, %v95_v47  ;;  %v120_v51 = vmul.f32 %v118_v39, %v95_v47 }
  0x90   :  { %v123_v54 = vadd.f32 %v119_v50, %v89_v44  ;;  %v124_v55 = vadd.f32 %v120_v51, %v90_v45  ;;  %v125_v56 = vadd.f32 %v121_v48, %v91_v52  ;;  %v126_v57 = vadd.f32 %v122_v49, %v92_v53 }
  0x92   :  { %v132_v58 = vpop.permute.xlu1 %131  ;;  %v137_v59 = vpop.permute.xlu0 %136 }
  0x93   :  { %v139_v60 = vadd.f32 %v132_v58, %v123_v54  ;;  %v140_v61 = vadd.f32 %v132_v58, %v124_v55  ;;  %v141_v62 = vadd.f32 %v137_v59, %v125_v56  ;;  %v142_v63 = vadd.f32 %v137_v59, %v126_v57 }
  0x95   :  { %v143_v1 = vmax.f32 %v139_v60, 0.0  ;;  %v144_v2 = vmax.f32 %v140_v61, 0.0  ;;  %v145_v3 = vmax.f32 %v141_v62, 0.0  ;;  %v146_v4 = vmax.f32 %v142_v63, 0.0 }
  0x96   :  { %v152_v0 = vpop.permute.xlu1 %151  ;;  %v181_v25 = vpop.permute.xlu0 %180 }
  0x97   :  { %v159_v6 = vmul.f32 %v152_v0, %v143_v1  ;;  %v160_v7 = vmul.f32 %v152_v0, %v144_v2  ;;  %v186_v29 = vrot.slane %v181_v25, %v323_v15 }
  0x9a   :  { %v157_v5 = vpop.permute.xlu1 %156 }
  0x9b   :  { %v161_v8 = vmul.f32 %v157_v5, %v145_v3  ;;  %v162_v9 = vmul.f32 %v157_v5, %v146_v4 }
  0x9d   :  { %v163_v10 = vadd.f32 %v161_v8, %v159_v6  ;;  %v170_v13 = vadd.f32 %v162_v9, %v160_v7 }
  0x9f   :  { %v164_v14 = vrot.slane %v163_v10, 4  ;;  %v171_v16 = vrot.slane %v170_v13, 4 }
  0xa1   :  { %v165_v17 = vadd.f32 %v164_v14, %v163_v10  ;;  %v172_v18 = vadd.f32 %v171_v16, %v170_v13 }
  0xa3   :  { %v166_v19 = vrot.slane %v165_v17, 2  ;;  %v173_v20 = vrot.slane %v172_v18, 2 }
  0xa5   :  { %v167_v23 = vadd.f32 %v166_v19, %v165_v17  ;;  %v174_v24 = vadd.f32 %v173_v20, %v172_v18 }
  0xa7   :  { %v168_v26 = vrot.slane %v167_v23, 1  ;;  %v175_v27 = vrot.slane %v174_v24, 1 }
  0xa9   :  { %v169_v30 = vadd.f32 %v168_v26, %v167_v23  ;;  %v176_v31 = vadd.f32 %v175_v27, %v174_v24 }
  0xab   :  { %v187_v32 = vadd.f32 %v186_v29, %v169_v30  ;;  %v188_v33 = vadd.f32 %v186_v29, %v176_v31 }
  0xad   :  { %v191_v35 = vcombine.low %v187_v32, %v188_v33 }
  0xaf   :  { %v198_v36 = vrot.slane %v191_v35, %v197_v34 }
  0xb1   :  { %v205_v37 = vrot.slane %v198_v36, %v197_v34 }
  0xb3   :  { %211 = vst.msk [vmem:[#allocation3] sm:$0x3] %vm209_vm0, %v205_v37 }
  0xb4   :  { %248 = shalt.err (!%p245_p4)
}
  0xb5   :  { %s249_s9 = scalar_lea.hbm %s354_s5, 32 }
  0xb6   :  { %p250_p5 = scmp.ne.s32.totalorder %s354_s5, %s249_s9  ;;  %p253_p6 = scmp.lt.u32.totalorder %s249_s9, %s354_s5 }
  0xb8   :  { %p255_p7 = pnand %p253_p6, %p250_p5 }
  0xba   :  { %258 = shalt.err (!%p255_p7)
}
  0xbb   :  { %221 = dma.vmem_to_hbm [thread:$0]  %s219_s3, 32, %s354_s5, [#allocation4]  }
  0xbc   :  { %259 = dma.done.wait [#allocation4], 32  }
  0xbd   :  { %260 = vsyncadd [#allocation4], 4294967264 }
  0xbe   :  { %225 = vsyncpa [#allocation4], 1 }

</bundles_post_ra>
